<compile_context>
chip_gen: v5e
topology: v5e:2x2
jax: 0.10.0
libtpu: 0.0.40
codegen_flags: <defaults>
</compile_context>

<pallas_src>
from functools import partial

import jax
import jax.numpy as jnp
from jax.experimental import pallas as pl
from jax.experimental.pallas import tpu as pltpu


_LANE = 128
_SUBLANE = 8
_CO_BLOCK = 8          # output-channel sub-block held in the vreg-resident accumulator
_ACC_PAIR_ELEMS = 8 * 1024   # ~8 f32 vregs for the (real, imag) accumulator pair
_STATIC_CI = 8         # <= this: fully static (unrolled) Ci loop
_CI_UNROLL = 4         # partial unroll for large Ci


def _round_up(n, m):
    return -(-n // m) * m


def _vmem_budgets():
    """Generation-aware scoped-VMEM limit and double-buffered tile budget."""
    try:
        cap = pltpu.get_tpu_info().vmem_capacity_bytes
    except Exception:                      # conservative fallback (v7x-sized)
        cap = 64 << 20
    # 48 MiB limit on v7x (64 MiB VMEM), 96 MiB on v5e/v6e (128 MiB VMEM).
    vmem_limit = min(cap * 3 // 4, cap - (8 << 20))
    tile_budget = cap * 2 // 5             # ~25 MiB v7x, ~51 MiB v5e/v6e
    return int(tile_budget), int(vmem_limit)


def _pick_lane_tile(n_modes, batch, ci, co):
    """Lane tile (multiple of 128) for the flattened corner-major mode axis."""
    tile_budget, _ = _vmem_budgets()
    # Sublane-padded rows of the resident f32 planes per lane column.
    rows = (_round_up(ci * batch, _SUBLANE)
            + _round_up(ci * co, _SUBLANE)
            + _round_up(batch * co, _SUBLANE))
    per_lane = 4 * 2 * 2 * rows            # f32 * (re,im) * double-buffer
    budget_lanes = max(_LANE, (tile_budget // per_lane) // _LANE * _LANE)
    # Keep the vreg-resident accumulator pair (co_blk, tm) x 2 small.
    co_blk = _round_up(min(co, _CO_BLOCK), _SUBLANE)
    vreg_lanes = max(_LANE, (_ACC_PAIR_ELEMS // (2 * co_blk)) // _LANE * _LANE)
    # >= 2 grid steps whenever possible so v7x can use both TensorCores.
    half_lanes = _round_up(-(-n_modes // 2), _LANE)
    return max(_LANE, min(budget_lanes, vreg_lanes, half_lanes))


def _spectral_mul(xr, xi, wr, wi, batch, ci, co, tm):
    """out[b*Co+o, l] = sum_i x[i*B+b, l] * w[i*Co+o, l]   (complex, split planes).

    xr/xi: f32 (Ci*B, Lp); wr/wi: f32 (Ci*Co, Lp); Lp a multiple of tm.
    Returns (out_r, out_i): f32 (B*Co, Lp).
    """
    cib, lp = xr.shape
    cico = wr.shape[0]
    assert cib == ci * batch and cico == ci * co
    assert lp % tm == 0 and tm % _LANE == 0
    bco = batch * co
    co_blk = min(co, _CO_BLOCK)

    def kernel(xr_ref, xi_ref, wr_ref, wi_ref, or_ref, oi_ref):
        tile = or_ref.shape[-1]

        def mac(i, bb, c0, cb, acc_r, acc_i):
            xrow = i * batch + bb
            wrow = i * co + c0
            xr_v = xr_ref[pl.ds(xrow, 1), :]          # (1, tile)  broadcast over Co
            xi_v = xi_ref[pl.ds(xrow, 1), :]
            wr_v = wr_ref[pl.ds(wrow, cb), :]         # (cb, tile)
            wi_v = wi_ref[pl.ds(wrow, cb), :]
            # 3-multiply complex MAC: (xr + j xi) * (wr + j wi)
            k1 = (xr_v + xi_v) * wr_v
            acc_r = acc_r + (k1 - xi_v * (wr_v + wi_v))
            acc_i = acc_i + (k1 + xr_v * (wi_v - wr_v))
            return acc_r, acc_i

        for bb in range(batch):
            for c0 in range(0, co, co_blk):
                cb = min(co_blk, co - c0)
                acc_r = jnp.zeros((cb, tile), jnp.float32)
                acc_i = jnp.zeros((cb, tile), jnp.float32)
                if ci <= _STATIC_CI:
                    # fully static slicing + full unroll for small channel counts
                    for i in range(ci):
                        acc_r, acc_i = mac(i, bb, c0, cb, acc_r, acc_i)
                else:
                    def body(i, carry):
                        return mac(i, bb, c0, cb, *carry)
                    acc_r, acc_i = jax.lax.fori_loop(
                        0, ci, body, (acc_r, acc_i), unroll=_CI_UNROLL)
                # single store per output sub-tile (accumulator stayed in vregs)
                or_ref[pl.ds(bb * co + c0, cb), :] = acc_r
                oi_ref[pl.ds(bb * co + c0, cb), :] = acc_i

    _, vmem_limit = _vmem_budgets()
    out_r, out_i = pl.pallas_call(
        kernel,
        out_shape=(jax.ShapeDtypeStruct((bco, lp), jnp.float32),
                   jax.ShapeDtypeStruct((bco, lp), jnp.float32)),
        grid_spec=pltpu.PrefetchScalarGridSpec(
            num_scalar_prefetch=0,
            grid=(lp // tm,),
            in_specs=[
                pl.BlockSpec((cib, tm), lambda t: (0, t)),
                pl.BlockSpec((cib, tm), lambda t: (0, t)),
                pl.BlockSpec((cico, tm), lambda t: (0, t)),
                pl.BlockSpec((cico, tm), lambda t: (0, t)),
            ],
            out_specs=[
                pl.BlockSpec((bco, tm), lambda t: (0, t)),
                pl.BlockSpec((bco, tm), lambda t: (0, t)),
            ],
        ),
        compiler_params=pltpu.CompilerParams(
            dimension_semantics=("parallel",),
            vmem_limit_bytes=vmem_limit),
    )(xr, xi, wr, wi)
    return out_r, out_i


@partial(jax.jit, static_argnums=(3, 4, 5, 6, 7))
def _spectral_conv3d_forward(x, wr, wi, m1, m2, m3, ci, co):
    B, Ci, X, Y, Z = x.shape
    assert Ci == ci
    # Same implicit assumption as the PyTorch original; made explicit here.
    assert 2 * m1 <= X and 2 * m2 <= Y and m3 <= Z // 2 + 1, \
        "corner mode blocks overlap the spatial/frequency extent"

    L = 4 * m1 * m2 * m3
    tm = _pick_lane_tile(L, B, ci, co)
    lp = _round_up(L, tm)

    x_ft = jnp.fft.rfftn(x, axes=(-3, -2, -1))

    # The 4 retained corner mode blocks, folded into a corner-major lane axis.
    blk1 = x_ft[:, :, :m1, :m2, :m3]
    blk2 = x_ft[:, :, X - m1:, :m2, :m3]
    blk3 = x_ft[:, :, :m1, Y - m2:, :m3]
    blk4 = x_ft[:, :, X - m1:, Y - m2:, :m3]
    xb = jnp.stack([blk1, blk2, blk3, blk4], axis=2)          # (B, Ci, 4, m1, m2, m3)
    xb = xb.reshape(B, ci, L).transpose(1, 0, 2).reshape(ci * B, L)

    pad_x = lp - L
    xr = jnp.real(xb).astype(jnp.float32)
    xi = jnp.imag(xb).astype(jnp.float32)
    if pad_x:
        xr = jnp.pad(xr, ((0, 0), (0, pad_x)))
        xi = jnp.pad(xi, ((0, 0), (0, pad_x)))

    pad_w = lp - wr.shape[-1]
    if pad_w:
        wr = jnp.pad(wr, ((0, 0), (0, pad_w)))
        wi = jnp.pad(wi, ((0, 0), (0, pad_w)))

    out_r, out_i = _spectral_mul(xr, xi, wr, wi, B, ci, co, tm)

    out = jax.lax.complex(out_r[:, :L], out_i[:, :L])
    out = out.reshape(B, co, 4, m1, m2, m3)                   # corner-major

    Zf = Z // 2 + 1
    out_ft = jnp.zeros((B, co, X, Y, Zf), jnp.complex64)
    out_ft = out_ft.at[:, :, :m1, :m2, :m3].set(out[:, :, 0])
    out_ft = out_ft.at[:, :, X - m1:, :m2, :m3].set(out[:, :, 1])
    out_ft = out_ft.at[:, :, :m1, Y - m2:, :m3].set(out[:, :, 2])
    out_ft = out_ft.at[:, :, X - m1:, Y - m2:, :m3].set(out[:, :, 3])

    return jnp.fft.irfftn(out_ft, s=(X, Y, Z), axes=(-3, -2, -1))


class SpectralConv3d:
    """JAX/Pallas port of the PyTorch SpectralConv3d module."""

    def __init__(self, in_channels, out_channels, modes1, modes2, modes3, key):
        self.in_channels = in_channels
        self.out_channels = out_channels
        self.modes1 = modes1
        self.modes2 = modes2
        self.modes3 = modes3
        scale = 1.0 / (in_channels * out_channels)
        shape = (in_channels, out_channels, modes1, modes2, modes3)
        ks = jax.random.split(key, 8)

        def mk_weight(kr, ki):
            re = scale * jax.random.uniform(kr, shape, jnp.float32)
            im = scale * jax.random.uniform(ki, shape, jnp.float32)
            return jax.lax.complex(re, im)

        # mirrors: scale * torch.rand(..., dtype=torch.cfloat) (uniform re & im)
        self.weights1 = mk_weight(ks[0], ks[1])
        self.weights2 = mk_weight(ks[2], ks[3])
        self.weights3 = mk_weight(ks[4], ks[5])
        self.weights4 = mk_weight(ks[6], ks[7])

        # Pre-split / pre-stack weights once: row = i*Co + o, lane = corner-major mode.
        L = 4 * modes1 * modes2 * modes3
        self._L = L
        l128 = _round_up(L, _LANE)
        w = jnp.stack(
            [self.weights1, self.weights2, self.weights3, self.weights4],
            axis=2,
        ).reshape(in_channels * out_channels, L)              # (Ci*Co, L)
        wr = jnp.real(w).astype(jnp.float32)
        wi = jnp.imag(w).astype(jnp.float32)
        pad = l128 - L
        if pad:
            wr = jnp.pad(wr, ((0, 0), (0, pad)))
            wi = jnp.pad(wi, ((0, 0), (0, pad)))
        self._wr = wr
        self._wi = wi

    def __call__(self, x):
        return _spectral_conv3d_forward(
            x, self._wr, self._wi,
            self.modes1, self.modes2, self.modes3,
            self.in_channels, self.out_channels)


def _reference_forward(layer, x):
    """Pure-JAX reference (no Pallas) for a correctness sanity check."""
    B, Ci, X, Y, Z = x.shape
    m1, m2, m3 = layer.modes1, layer.modes2, layer.modes3
    Co = layer.out_channels
    x_ft = jnp.fft.rfftn(x, axes=(-3, -2, -1)).astype(jnp.complex64)
    out_ft = jnp.zeros((B, Co, X, Y, Z // 2 + 1), jnp.complex64)
    cm = lambda a, w: jnp.einsum('bixyz,ioxyz->boxyz', a, w)
    out_ft = out_ft.at[:, :, :m1, :m2, :m3].set(
        cm(x_ft[:, :, :m1, :m2, :m3], layer.weights1))
    out_ft = out_ft.at[:, :, X - m1:, :m2, :m3].set(
        cm(x_ft[:, :, X - m1:, :m2, :m3], layer.weights2))
    out_ft = out_ft.at[:, :, :m1, Y - m2:, :m3].set(
        cm(x_ft[:, :, :m1, Y - m2:, :m3], layer.weights3))
    out_ft = out_ft.at[:, :, X - m1:, Y - m2:, :m3].set(
        cm(x_ft[:, :, X - m1:, Y - m2:, :m3], layer.weights4))
    return jnp.fft.irfftn(out_ft, s=(X, Y, Z), axes=(-3, -2, -1))


if __name__ == "__main__":
    key = jax.random.PRNGKey(0)
    k_w, k_x = jax.random.split(key)

    B, Ci, Co = 2, 4, 4
    X, Y, Z = 16, 16, 16
    m1, m2, m3 = 4, 4, 4

    layer = SpectralConv3d(Ci, Co, m1, m2, m3, k_w)
    x = jax.random.normal(k_x, (B, Ci, X, Y, Z), jnp.float32)

    out = layer(x)
    out = jax.block_until_ready(out)
    assert out.shape == (B, Co, X, Y, Z), out.shape

    ref = jax.block_until_ready(_reference_forward(layer, x))
    assert jnp.allclose(out, ref, atol=1e-4, rtol=1e-4), "mismatch vs reference"

    print("KERNEL_OK")
</pallas_src>

<mosaic_0001>
module attributes {stable_mosaic.version = 11 : i64} {
  func.func @kernel(%arg0: i32, %arg1: memref<8x128xf32, #tpu.memory_space<vmem>>, %arg2: memref<8x128xf32, #tpu.memory_space<vmem>>, %arg3: memref<16x128xf32, #tpu.memory_space<vmem>>, %arg4: memref<16x128xf32, #tpu.memory_space<vmem>>, %arg5: memref<8x128xf32, #tpu.memory_space<vmem>>, %arg6: memref<8x128xf32, #tpu.memory_space<vmem>>) attributes {dimension_semantics = [#tpu.dimension_semantics<parallel>], iteration_bounds = array<i64: 2>, scalar_prefetch = 0 : i64, scratch_operands = 0 : i64, tpu.core_type = #tpu.core_type<tc>, window_params = [{transform_indices = @transform_0, window_bounds = array<i64: 8, 128>}, {transform_indices = @transform_1, window_bounds = array<i64: 8, 128>}, {transform_indices = @transform_2, window_bounds = array<i64: 16, 128>}, {transform_indices = @transform_3, window_bounds = array<i64: 16, 128>}, {transform_indices = @transform_4, window_bounds = array<i64: 8, 128>}, {transform_indices = @transform_5, window_bounds = array<i64: 8, 128>}]} {
    %cst = arith.constant 0.000000e+00 : f32
    %0 = vector.broadcast %cst : f32 to vector<4x128xf32>
    %cst_0 = arith.constant 0.000000e+00 : f32
    %1 = vector.broadcast %cst_0 : f32 to vector<4x128xf32>
    %c0 = arith.constant 0 : index
    %c0_1 = arith.constant 0 : index
    %2 = vector.load %arg1[%c0, %c0_1] : memref<8x128xf32, #tpu.memory_space<vmem>>, vector<1x128xf32>
    %c0_2 = arith.constant 0 : index
    %c0_3 = arith.constant 0 : index
    %3 = vector.load %arg2[%c0_2, %c0_3] : memref<8x128xf32, #tpu.memory_space<vmem>>, vector<1x128xf32>
    %c0_4 = arith.constant 0 : index
    %c0_5 = arith.constant 0 : index
    %4 = vector.load %arg3[%c0_4, %c0_5] : memref<16x128xf32, #tpu.memory_space<vmem>>, vector<4x128xf32>
    %c0_6 = arith.constant 0 : index
    %c0_7 = arith.constant 0 : index
    %5 = vector.load %arg4[%c0_6, %c0_7] : memref<16x128xf32, #tpu.memory_space<vmem>>, vector<4x128xf32>
    %6 = arith.addf %2, %3 : vector<1x128xf32>
    %7 = vector.broadcast %6 : vector<1x128xf32> to vector<4x128xf32>
    %8 = arith.mulf %7, %4 : vector<4x128xf32>
    %9 = arith.addf %4, %5 : vector<4x128xf32>
    %10 = vector.broadcast %3 : vector<1x128xf32> to vector<4x128xf32>
    %11 = arith.mulf %10, %9 : vector<4x128xf32>
    %12 = arith.subf %8, %11 : vector<4x128xf32>
    %13 = arith.addf %0, %12 : vector<4x128xf32>
    %14 = arith.subf %5, %4 : vector<4x128xf32>
    %15 = vector.broadcast %2 : vector<1x128xf32> to vector<4x128xf32>
    %16 = arith.mulf %15, %14 : vector<4x128xf32>
    %17 = arith.addf %8, %16 : vector<4x128xf32>
    %18 = arith.addf %1, %17 : vector<4x128xf32>
    %c2 = arith.constant 2 : index
    %c0_8 = arith.constant 0 : index
    %19 = vector.load %arg1[%c2, %c0_8] : memref<8x128xf32, #tpu.memory_space<vmem>>, vector<1x128xf32>
    %c2_9 = arith.constant 2 : index
    %c0_10 = arith.constant 0 : index
    %20 = vector.load %arg2[%c2_9, %c0_10] : memref<8x128xf32, #tpu.memory_space<vmem>>, vector<1x128xf32>
    %c4 = arith.constant 4 : index
    %c0_11 = arith.constant 0 : index
    %21 = vector.load %arg3[%c4, %c0_11] : memref<16x128xf32, #tpu.memory_space<vmem>>, vector<4x128xf32>
    %c4_12 = arith.constant 4 : index
    %c0_13 = arith.constant 0 : index
    %22 = vector.load %arg4[%c4_12, %c0_13] : memref<16x128xf32, #tpu.memory_space<vmem>>, vector<4x128xf32>
    %23 = arith.addf %19, %20 : vector<1x128xf32>
    %24 = vector.broadcast %23 : vector<1x128xf32> to vector<4x128xf32>
    %25 = arith.mulf %24, %21 : vector<4x128xf32>
    %26 = arith.addf %21, %22 : vector<4x128xf32>
    %27 = vector.broadcast %20 : vector<1x128xf32> to vector<4x128xf32>
    %28 = arith.mulf %27, %26 : vector<4x128xf32>
    %29 = arith.subf %25, %28 : vector<4x128xf32>
    %30 = arith.addf %13, %29 : vector<4x128xf32>
    %31 = arith.subf %22, %21 : vector<4x128xf32>
    %32 = vector.broadcast %19 : vector<1x128xf32> to vector<4x128xf32>
    %33 = arith.mulf %32, %31 : vector<4x128xf32>
    %34 = arith.addf %25, %33 : vector<4x128xf32>
    %35 = arith.addf %18, %34 : vector<4x128xf32>
    %c4_14 = arith.constant 4 : index
    %c0_15 = arith.constant 0 : index
    %36 = vector.load %arg1[%c4_14, %c0_15] : memref<8x128xf32, #tpu.memory_space<vmem>>, vector<1x128xf32>
    %c4_16 = arith.constant 4 : index
    %c0_17 = arith.constant 0 : index
    %37 = vector.load %arg2[%c4_16, %c0_17] : memref<8x128xf32, #tpu.memory_space<vmem>>, vector<1x128xf32>
    %c8 = arith.constant 8 : index
    %c0_18 = arith.constant 0 : index
    %38 = vector.load %arg3[%c8, %c0_18] : memref<16x128xf32, #tpu.memory_space<vmem>>, vector<4x128xf32>
    %c8_19 = arith.constant 8 : index
    %c0_20 = arith.constant 0 : index
    %39 = vector.load %arg4[%c8_19, %c0_20] : memref<16x128xf32, #tpu.memory_space<vmem>>, vector<4x128xf32>
    %40 = arith.addf %36, %37 : vector<1x128xf32>
    %41 = vector.broadcast %40 : vector<1x128xf32> to vector<4x128xf32>
    %42 = arith.mulf %41, %38 : vector<4x128xf32>
    %43 = arith.addf %38, %39 : vector<4x128xf32>
    %44 = vector.broadcast %37 : vector<1x128xf32> to vector<4x128xf32>
    %45 = arith.mulf %44, %43 : vector<4x128xf32>
    %46 = arith.subf %42, %45 : vector<4x128xf32>
    %47 = arith.addf %30, %46 : vector<4x128xf32>
    %48 = arith.subf %39, %38 : vector<4x128xf32>
    %49 = vector.broadcast %36 : vector<1x128xf32> to vector<4x128xf32>
    %50 = arith.mulf %49, %48 : vector<4x128xf32>
    %51 = arith.addf %42, %50 : vector<4x128xf32>
    %52 = arith.addf %35, %51 : vector<4x128xf32>
    %c6 = arith.constant 6 : index
    %c0_21 = arith.constant 0 : index
    %53 = vector.load %arg1[%c6, %c0_21] : memref<8x128xf32, #tpu.memory_space<vmem>>, vector<1x128xf32>
    %c6_22 = arith.constant 6 : index
    %c0_23 = arith.constant 0 : index
    %54 = vector.load %arg2[%c6_22, %c0_23] : memref<8x128xf32, #tpu.memory_space<vmem>>, vector<1x128xf32>
    %c12 = arith.constant 12 : index
    %c0_24 = arith.constant 0 : index
    %55 = vector.load %arg3[%c12, %c0_24] : memref<16x128xf32, #tpu.memory_space<vmem>>, vector<4x128xf32>
    %c12_25 = arith.constant 12 : index
    %c0_26 = arith.constant 0 : index
    %56 = vector.load %arg4[%c12_25, %c0_26] : memref<16x128xf32, #tpu.memory_space<vmem>>, vector<4x128xf32>
    %57 = arith.addf %53, %54 : vector<1x128xf32>
    %58 = vector.broadcast %57 : vector<1x128xf32> to vector<4x128xf32>
    %59 = arith.mulf %58, %55 : vector<4x128xf32>
    %60 = arith.addf %55, %56 : vector<4x128xf32>
    %61 = vector.broadcast %54 : vector<1x128xf32> to vector<4x128xf32>
    %62 = arith.mulf %61, %60 : vector<4x128xf32>
    %63 = arith.subf %59, %62 : vector<4x128xf32>
    %64 = arith.addf %47, %63 : vector<4x128xf32>
    %65 = arith.subf %56, %55 : vector<4x128xf32>
    %66 = vector.broadcast %53 : vector<1x128xf32> to vector<4x128xf32>
    %67 = arith.mulf %66, %65 : vector<4x128xf32>
    %68 = arith.addf %59, %67 : vector<4x128xf32>
    %69 = arith.addf %52, %68 : vector<4x128xf32>
    %c0_27 = arith.constant 0 : index
    %c0_28 = arith.constant 0 : index
    %70 = vector.load %arg5[%c0_27, %c0_28] : memref<8x128xf32, #tpu.memory_space<vmem>>, vector<4x128xf32>
    tpu.vector_store %arg5[%c0_27, %c0_28], %64 {strides = array<i32>} : memref<8x128xf32, #tpu.memory_space<vmem>>, vector<4x128xf32>,
    %c0_29 = arith.constant 0 : index
    %c0_30 = arith.constant 0 : index
    %71 = vector.load %arg6[%c0_29, %c0_30] : memref<8x128xf32, #tpu.memory_space<vmem>>, vector<4x128xf32>
    tpu.vector_store %arg6[%c0_29, %c0_30], %69 {strides = array<i32>} : memref<8x128xf32, #tpu.memory_space<vmem>>, vector<4x128xf32>,
    %cst_31 = arith.constant 0.000000e+00 : f32
    %72 = vector.broadcast %cst_31 : f32 to vector<4x128xf32>
    %cst_32 = arith.constant 0.000000e+00 : f32
    %73 = vector.broadcast %cst_32 : f32 to vector<4x128xf32>
    %c1 = arith.constant 1 : index
    %c0_33 = arith.constant 0 : index
    %74 = vector.load %arg1[%c1, %c0_33] : memref<8x128xf32, #tpu.memory_space<vmem>>, vector<1x128xf32>
    %c1_34 = arith.constant 1 : index
    %c0_35 = arith.constant 0 : index
    %75 = vector.load %arg2[%c1_34, %c0_35] : memref<8x128xf32, #tpu.memory_space<vmem>>, vector<1x128xf32>
    %c0_36 = arith.constant 0 : index
    %c0_37 = arith.constant 0 : index
    %76 = vector.load %arg3[%c0_36, %c0_37] : memref<16x128xf32, #tpu.memory_space<vmem>>, vector<4x128xf32>
    %c0_38 = arith.constant 0 : index
    %c0_39 = arith.constant 0 : index
    %77 = vector.load %arg4[%c0_38, %c0_39] : memref<16x128xf32, #tpu.memory_space<vmem>>, vector<4x128xf32>
    %78 = arith.addf %74, %75 : vector<1x128xf32>
    %79 = vector.broadcast %78 : vector<1x128xf32> to vector<4x128xf32>
    %80 = arith.mulf %79, %76 : vector<4x128xf32>
    %81 = arith.addf %76, %77 : vector<4x128xf32>
    %82 = vector.broadcast %75 : vector<1x128xf32> to vector<4x128xf32>
    %83 = arith.mulf %82, %81 : vector<4x128xf32>
    %84 = arith.subf %80, %83 : vector<4x128xf32>
    %85 = arith.addf %72, %84 : vector<4x128xf32>
    %86 = arith.subf %77, %76 : vector<4x128xf32>
    %87 = vector.broadcast %74 : vector<1x128xf32> to vector<4x128xf32>
    %88 = arith.mulf %87, %86 : vector<4x128xf32>
    %89 = arith.addf %80, %88 : vector<4x128xf32>
    %90 = arith.addf %73, %89 : vector<4x128xf32>
    %c3 = arith.constant 3 : index
    %c0_40 = arith.constant 0 : index
    %91 = vector.load %arg1[%c3, %c0_40] : memref<8x128xf32, #tpu.memory_space<vmem>>, vector<1x128xf32>
    %c3_41 = arith.constant 3 : index
    %c0_42 = arith.constant 0 : index
    %92 = vector.load %arg2[%c3_41, %c0_42] : memref<8x128xf32, #tpu.memory_space<vmem>>, vector<1x128xf32>
    %c4_43 = arith.constant 4 : index
    %c0_44 = arith.constant 0 : index
    %93 = vector.load %arg3[%c4_43, %c0_44] : memref<16x128xf32, #tpu.memory_space<vmem>>, vector<4x128xf32>
    %c4_45 = arith.constant 4 : index
    %c0_46 = arith.constant 0 : index
    %94 = vector.load %arg4[%c4_45, %c0_46] : memref<16x128xf32, #tpu.memory_space<vmem>>, vector<4x128xf32>
    %95 = arith.addf %91, %92 : vector<1x128xf32>
    %96 = vector.broadcast %95 : vector<1x128xf32> to vector<4x128xf32>
    %97 = arith.mulf %96, %93 : vector<4x128xf32>
    %98 = arith.addf %93, %94 : vector<4x128xf32>
    %99 = vector.broadcast %92 : vector<1x128xf32> to vector<4x128xf32>
    %100 = arith.mulf %99, %98 : vector<4x128xf32>
    %101 = arith.subf %97, %100 : vector<4x128xf32>
    %102 = arith.addf %85, %101 : vector<4x128xf32>
    %103 = arith.subf %94, %93 : vector<4x128xf32>
    %104 = vector.broadcast %91 : vector<1x128xf32> to vector<4x128xf32>
    %105 = arith.mulf %104, %103 : vector<4x128xf32>
    %106 = arith.addf %97, %105 : vector<4x128xf32>
    %107 = arith.addf %90, %106 : vector<4x128xf32>
    %c5 = arith.constant 5 : index
    %c0_47 = arith.constant 0 : index
    %108 = vector.load %arg1[%c5, %c0_47] : memref<8x128xf32, #tpu.memory_space<vmem>>, vector<1x128xf32>
    %c5_48 = arith.constant 5 : index
    %c0_49 = arith.constant 0 : index
    %109 = vector.load %arg2[%c5_48, %c0_49] : memref<8x128xf32, #tpu.memory_space<vmem>>, vector<1x128xf32>
    %c8_50 = arith.constant 8 : index
    %c0_51 = arith.constant 0 : index
    %110 = vector.load %arg3[%c8_50, %c0_51] : memref<16x128xf32, #tpu.memory_space<vmem>>, vector<4x128xf32>
    %c8_52 = arith.constant 8 : index
    %c0_53 = arith.constant 0 : index
    %111 = vector.load %arg4[%c8_52, %c0_53] : memref<16x128xf32, #tpu.memory_space<vmem>>, vector<4x128xf32>
    %112 = arith.addf %108, %109 : vector<1x128xf32>
    %113 = vector.broadcast %112 : vector<1x128xf32> to vector<4x128xf32>
    %114 = arith.mulf %113, %110 : vector<4x128xf32>
    %115 = arith.addf %110, %111 : vector<4x128xf32>
    %116 = vector.broadcast %109 : vector<1x128xf32> to vector<4x128xf32>
    %117 = arith.mulf %116, %115 : vector<4x128xf32>
    %118 = arith.subf %114, %117 : vector<4x128xf32>
    %119 = arith.addf %102, %118 : vector<4x128xf32>
    %120 = arith.subf %111, %110 : vector<4x128xf32>
    %121 = vector.broadcast %108 : vector<1x128xf32> to vector<4x128xf32>
    %122 = arith.mulf %121, %120 : vector<4x128xf32>
    %123 = arith.addf %114, %122 : vector<4x128xf32>
    %124 = arith.addf %107, %123 : vector<4x128xf32>
    %c7 = arith.constant 7 : index
    %c0_54 = arith.constant 0 : index
    %125 = vector.load %arg1[%c7, %c0_54] : memref<8x128xf32, #tpu.memory_space<vmem>>, vector<1x128xf32>
    %c7_55 = arith.constant 7 : index
    %c0_56 = arith.constant 0 : index
    %126 = vector.load %arg2[%c7_55, %c0_56] : memref<8x128xf32, #tpu.memory_space<vmem>>, vector<1x128xf32>
    %c12_57 = arith.constant 12 : index
    %c0_58 = arith.constant 0 : index
    %127 = vector.load %arg3[%c12_57, %c0_58] : memref<16x128xf32, #tpu.memory_space<vmem>>, vector<4x128xf32>
    %c12_59 = arith.constant 12 : index
    %c0_60 = arith.constant 0 : index
    %128 = vector.load %arg4[%c12_59, %c0_60] : memref<16x128xf32, #tpu.memory_space<vmem>>, vector<4x128xf32>
    %129 = arith.addf %125, %126 : vector<1x128xf32>
    %130 = vector.broadcast %129 : vector<1x128xf32> to vector<4x128xf32>
    %131 = arith.mulf %130, %127 : vector<4x128xf32>
    %132 = arith.addf %127, %128 : vector<4x128xf32>
    %133 = vector.broadcast %126 : vector<1x128xf32> to vector<4x128xf32>
    %134 = arith.mulf %133, %132 : vector<4x128xf32>
    %135 = arith.subf %131, %134 : vector<4x128xf32>
    %136 = arith.addf %119, %135 : vector<4x128xf32>
    %137 = arith.subf %128, %127 : vector<4x128xf32>
    %138 = vector.broadcast %125 : vector<1x128xf32> to vector<4x128xf32>
    %139 = arith.mulf %138, %137 : vector<4x128xf32>
    %140 = arith.addf %131, %139 : vector<4x128xf32>
    %141 = arith.addf %124, %140 : vector<4x128xf32>
    %c4_61 = arith.constant 4 : index
    %c0_62 = arith.constant 0 : index
    %142 = vector.load %arg5[%c4_61, %c0_62] : memref<8x128xf32, #tpu.memory_space<vmem>>, vector<4x128xf32>
    tpu.vector_store %arg5[%c4_61, %c0_62], %136 {strides = array<i32>} : memref<8x128xf32, #tpu.memory_space<vmem>>, vector<4x128xf32>,
    %c4_63 = arith.constant 4 : index
    %c0_64 = arith.constant 0 : index
    %143 = vector.load %arg6[%c4_63, %c0_64] : memref<8x128xf32, #tpu.memory_space<vmem>>, vector<4x128xf32>
    tpu.vector_store %arg6[%c4_63, %c0_64], %141 {strides = array<i32>} : memref<8x128xf32, #tpu.memory_space<vmem>>, vector<4x128xf32>,
    return
  }
  func.func @transform_0(%arg0: i32) -> (i32, i32) {
    %c0_i32 = arith.constant 0 : i32
    %c0_i32_0 = arith.constant 0 : i32
    return %c0_i32, %arg0 : i32, i32
  }
  func.func @transform_1(%arg0: i32) -> (i32, i32) {
    %c0_i32 = arith.constant 0 : i32
    %c0_i32_0 = arith.constant 0 : i32
    return %c0_i32, %arg0 : i32, i32
  }
  func.func @transform_2(%arg0: i32) -> (i32, i32) {
    %c0_i32 = arith.constant 0 : i32
    %c0_i32_0 = arith.constant 0 : i32
    return %c0_i32, %arg0 : i32, i32
  }
  func.func @transform_3(%arg0: i32) -> (i32, i32) {
    %c0_i32 = arith.constant 0 : i32
    %c0_i32_0 = arith.constant 0 : i32
    return %c0_i32, %arg0 : i32, i32
  }
  func.func @transform_4(%arg0: i32) -> (i32, i32) {
    %c0_i32 = arith.constant 0 : i32
    %c0_i32_0 = arith.constant 0 : i32
    return %c0_i32, %arg0 : i32, i32
  }
  func.func @transform_5(%arg0: i32) -> (i32, i32) {
    %c0_i32 = arith.constant 0 : i32
    %c0_i32_0 = arith.constant 0 : i32
    return %c0_i32, %arg0 : i32, i32
  }
}

</mosaic_0001>

<bundles_post_ra>
// kernel: _spectral_conv3d_forward.1
= control target key start
LH: loop header
LB: loop body
LE: loop exit
PB: predicated region body
PF: predicated region fallthrough
CT: control target
= control target key end

     0   :  { %s749_s18 = smov 0   ;;  %s751_s19 = smov 0   ;;  %s907_s0 = inlined_call_operand.vmem [shape: f32[8,256], index: 0, kind: input, shape index: {}]   ;;  %s908_s1 = inlined_call_operand.vmem [shape: f32[8,256], index: 1, kind: input, shape index: {}]   ;;  %s909_s2 = inlined_call_operand.vmem [shape: f32[16,256], index: 2, kind: input, shape index: {}]   ;;  %s910_s3 = inlined_call_operand.vmem [shape: f32[16,256], index: 3, kind: input, shape index: {}]   ;;  %s911_s4 = inlined_call_operand.vmem [shape: f32[8,256], index: 4, kind: output, shape index: {0}]   ;;  %s912_s5 = inlined_call_operand.vmem [shape: f32[8,256], index: 5, kind: output, shape index: {1}]  }
   0x1   :  { %s753_s20 = smov 0  }
   0x2 LB: > { %s638_s21 = sadd.s32 4294967295, %s717_s20   ;;  %s766_s22 = sadd.s32 1, %s717_s20   ;;  %s717_s20 = sphi %s753_s20, %s916_s20   ;;  %s713_s19 = sphi %s751_s19, %s915_s19   ;;  %s709_s18 = sphi %s749_s18, %s914_s18  }
   0x3   : > { %s72_s23 = ssub.s32 %s717_s20, %s766_s22  ;;  %s75_s24 = sadd.s32 1, %s713_s19 }
   0x4   : > { %p73_p0 = scmp.eq.s32.totalorder %s72_s23, 0  ;;  %p82_p1 = scmp.ne.s32.totalorder %s713_s19, %s709_s18 }
   0x5   : > { %p83_p2 = scmp.eq.s32.totalorder %s717_s20, 0  ;;  %p641_p4 = scmp.ge.s32.totalorder %s717_s20, 2 }
   0x6   : > { %s775_s25 = scalar_select %p73_p0, %s713_s19, %s75_s24  }
   0x7   : > { %p777_p3 = por %p83_p2, %p82_p1  ;;  %186 = sbr.rel (%p641_p4) target bundleno = 24 (0x18), region = 16 }
   0xc   : > { %203 = sbr.rel (!%p777_p3) target bundleno = 18 (0x12), region = 28  ;;  %s205_s27 = sand.u32 (%p777_p3), 1, %s713_s19  }
   0xd   : > { %s643_s28 = sshll.u32 (%p777_p3), %s717_s20, 3  ;;  %s642_s29 = sshll.u32 (%p777_p3), %s205_s27, 4 }
   0xe   : > { %s209_s7 = scalar_lea.vmem (%p777_p3), %s909_s2, %s643_s28  ;;  %s207_s8 = scalar_lea.vmem (%p777_p3), [#allocation2], %s642_s29 }
   0xf   : > { %v240_v0 = vld [vmem:[%s209_s7] sm:$0xff] (%p777_p3)  ;;  %v242_v1 = vld [vmem:[%s209_s7 + $0x10] sm:$0xff] (%p777_p3) }
  0x10   : > { %241 = vst [vmem:[%s207_s8] sm:$0xff] (%p777_p3), %v240_v0 }
  0x11   : > { %243 = vst [vmem:[%s207_s8 + $0x8] sm:$0xff] %v242_v1 }
  0x12 PF: > { %249 = sbr.rel (!%p777_p3) target bundleno = 24 (0x18), region = 66  ;;  %s251_s9 = sand.u32 (%p777_p3), 1, %s713_s19  }
  0x13   : > { %s645_s10 = sshll.u32 (%p777_p3), %s717_s20, 3  ;;  %s644_s11 = sshll.u32 (%p777_p3), %s251_s9, 4 }
  0x14   : > { %s255_s14 = scalar_lea.vmem (%p777_p3), %s910_s3, %s645_s10  ;;  %s253_s15 = scalar_lea.vmem (%p777_p3), [#allocation3], %s644_s11 }
  0x15   : > { %v286_v2 = vld [vmem:[%s255_s14] sm:$0xff] (%p777_p3)  ;;  %v288_v3 = vld [vmem:[%s255_s14 + $0x10] sm:$0xff] (%p777_p3) }
  0x16   : > { %287 = vst [vmem:[%s253_s15] sm:$0xff] (%p777_p3), %v286_v2 }
  0x17   : > { %289 = vst [vmem:[%s253_s15 + $0x8] sm:$0xff] %v288_v3 }
  0x18 PF: > { %p646_p5 = scmp.ge.s32.totalorder %s717_s20, 1  ;;  %p294_p6 = scmp.lt.s32.totalorder %s717_s20, 3 }
  0x1a   : > { %p295_p7 = pnand %p646_p5, %p294_p6 }
  0x1b   : > { %s301_s16 = sand.u32 (!%p295_p7), 1, %s709_s18   ;;  %p350_p8 = scmp.lt.s32.totalorder (!%p295_p7), %s638_s21, 1 }
  0x1c   : > { %298 = sbr.rel (%p295_p7) target bundleno = 66 (0x42), region = 104  ;;  %s647_s17 = sshll.u32 (!%p295_p7), %s301_s16, 4 }
  0x1d   : > { %s803_s23 = scalar_lea.vmem (!%p295_p7), [#allocation2], %s647_s17  ;;  %s806_s24 = scalar_lea.vmem (!%p295_p7), [#allocation3], %s647_s17 }
  0x21   : > { %s918_s21 = smov (!%p350_p8, %s638_s21), 1  ;;  %v368_v4 = vld [vmem:[%s803_s23] sm:$0xf]  ;;  %v385_v6 = vld [vmem:[%s803_s23 + $0x4] sm:$0xf] }
  0x22   : > { %v369_v5 = vld [vmem:[%s806_s24] sm:$0xf]  ;;  %v386_v7 = vld [vmem:[%s806_s24 + $0x4] sm:$0xf]  ;;  %v402_v8 = vld [vmem:[%s803_s23 + $0x8] sm:$0xf] }
  0x23   : > { %s812_s18 = sshll.u32 %s918_s21, 3  ;;  %v403_v9 = vld [vmem:[%s806_s24 + $0x8] sm:$0xf]  ;;  %v419_v10 = vld [vmem:[%s803_s23 + $0xc] sm:$0xf]  ;;  %v373_v11 = vadd.f32 %v369_v5, %v368_v4  ;;  %v390_v18 = vadd.f32 %v386_v7, %v385_v6  ;;  %v378_v24 = vsub.f32 %v369_v5, %v368_v4  ;;  %v395_v30 = vsub.f32 %v386_v7, %v385_v6 }
  0x24   : > { %s820_s27 = scalar_lea.vmem %s907_s0, %s812_s18  ;;  %s826_s30 = scalar_lea.vmem %s908_s1, %s812_s18  ;;  %v420_v12 = vld [vmem:[%s806_s24 + $0xc] sm:$0xf]  ;;  %v830_v13 = vld [vmem:[%s803_s23] sm:$0xf]  ;;  %v407_v23 = vadd.f32 %v403_v9, %v402_v8  ;;  %v412_v31 = vsub.f32 %v403_v9, %v402_v8  ;;  %v456_v5 = vld [vmem:[%s806_s24 + $0x4] sm:$0xf] }
  0x25   : > { %v833_v14 = vld [vmem:[%s806_s24] sm:$0xf]  ;;  %v400_v26 = vld [vmem:[%s820_s27 + $0x4] sm:$0x1]  ;;  %v424_v29 = vadd.f32 %v420_v12, %v419_v10  ;;  %v417_v35 = vld [vmem:[%s820_s27 + $0x6] sm:$0x1]  ;;  %v429_v37 = vsub.f32 %v420_v12, %v419_v10  ;;  %s876_s7 = scalar_lea.vmem %s911_s4, %s812_s18  ;;  %s885_s10 = scalar_lea.vmem %s912_s5, %s812_s18 }
  0x26   : > { %v366_v15 = vld [vmem:[%s820_s27] sm:$0x1]  ;;  %v383_v20 = vld [vmem:[%s820_s27 + $0x2] sm:$0x1]  ;;  %v401_v27 = vld [vmem:[%s826_s30 + $0x4] sm:$0x1]  ;;  %v443_v43 = vadd.f32 %v833_v14, %v830_v13  ;;  %v448_v49 = vsub.f32 %v833_v14, %v830_v13 }
  0x27   : > { %v367_v16 = vld [vmem:[%s826_s30] sm:$0x1]  ;;  %v384_v21 = vld [vmem:[%s826_s30 + $0x2] sm:$0x1]  ;;  %v681_v28 = vld [vmem:[%s826_s30 + $0x4] ss:$0 sm:$0xff]  ;;  %v404_v34 = vadd.f32 %v401_v27, %v400_v26 }
  0x28   : > { %v679_v17 = vld [vmem:[%s826_s30] ss:$0 sm:$0xff]  ;;  %v370_v19 = vadd.f32 %v367_v16, %v366_v15  ;;  %v680_v22 = vld [vmem:[%s826_s30 + $0x2] ss:$0 sm:$0xff]  ;;  %v387_v25 = vadd.f32 %v384_v21, %v383_v20  ;;  %v418_v36 = vld [vmem:[%s826_s30 + $0x6] sm:$0x1]  ;;  %v409_v46 = vmul.f32 %v681_v28, %v407_v23 }
  0x29   : > { %v375_v33 = vmul.f32 %v679_v17, %v373_v11  ;;  %v392_v39 = vmul.f32 %v680_v22, %v390_v18  ;;  %v421_v40 = vadd.f32 %v418_v36, %v417_v35  ;;  %v682_v41 = vld [vmem:[%s826_s30 + $0x6] ss:$0 sm:$0xff]  ;;  %v683_v42 = vld [vmem:[%s820_s27] ss:$0 sm:$0xff]  ;;  %v405_v45 = vperm.slane %v404_v34, 0 }
  0x2a   : > { %v371_v32 = vperm.slane %v370_v19, 0  ;;  %v388_v38 = vperm.slane %v387_v25, 0  ;;  %v684_v47 = vld [vmem:[%s820_s27 + $0x2] ss:$0 sm:$0xff]  ;;  %v685_v48 = vld [vmem:[%s820_s27 + $0x4] ss:$0 sm:$0xff]  ;;  %v426_v52 = vmul.f32 %v682_v41, %v424_v29  ;;  %v380_v53 = vmul.f32 %v683_v42, %v378_v24 }
  0x2b   : > { %v422_v51 = vperm.slane %v421_v40, 0  ;;  %v686_v54 = vld [vmem:[%s820_s27 + $0x6] ss:$0 sm:$0xff]  ;;  %v436_v55 = vld [vmem:[%s820_s27 + $0x1] sm:$0x1]  ;;  %v406_v57 = vmul.f32 %v405_v45, %v402_v8  ;;  %v397_v58 = vmul.f32 %v684_v47, %v395_v30  ;;  %v414_v59 = vmul.f32 %v685_v48, %v412_v31 }
  0x2c   : > { %v372_v44 = vmul.f32 %v371_v32, %v368_v4  ;;  %v389_v50 = vmul.f32 %v388_v38, %v385_v6  ;;  %v437_v60 = vld [vmem:[%s826_s30 + $0x1] sm:$0x1]  ;;  %v453_v62 = vld [vmem:[%s820_s27 + $0x3] sm:$0x1]  ;;  %v431_v2 = vmul.f32 %v686_v54, %v429_v37  ;;  %v455_v4 = vld [vmem:[%s803_s23 + $0x4] sm:$0xf] }
  0x2d   : > { %v687_v61 = vld [vmem:[%s826_s30 + $0x1] ss:$0 sm:$0xff]  ;;  %v423_v0 = vmul.f32 %v422_v51, %v419_v10  ;;  %v454_v3 = vld [vmem:[%s826_s30 + $0x3] sm:$0x1]  ;;  %v410_v6 = vsub.f32 %v406_v57, %v409_v46  ;;  %v415_v8 = vadd.f32 %v414_v59, %v406_v57  ;;  %v440_v9 = vadd.f32 %v437_v60, %v436_v55  ;;  %v470_v12 = vld [vmem:[%s820_s27 + $0x5] sm:$0x1] }
  0x2e   : > { %v376_v56 = vsub.f32 %v372_v44, %v375_v33  ;;  %v393_v63 = vsub.f32 %v389_v50, %v392_v39  ;;  %v381_v1 = vadd.f32 %v380_v53, %v372_v44  ;;  %v398_v7 = vadd.f32 %v397_v58, %v389_v50  ;;  %v688_v11 = vld [vmem:[%s826_s30 + $0x3] ss:$0 sm:$0xff]  ;;  %v471_v15 = vld [vmem:[%s826_s30 + $0x5] sm:$0x1]  ;;  %v472_v19 = vld [vmem:[%s803_s23 + $0x8] sm:$0xf] }
  0x2f   : > { %v427_v10 = vsub.f32 %v423_v0, %v426_v52  ;;  %v432_v17 = vadd.f32 %v431_v2, %v423_v0  ;;  %v445_v18 = vmul.f32 %v687_v61, %v443_v43  ;;  %v473_v20 = vld [vmem:[%s806_s24 + $0x8] sm:$0xf]  ;;  %v689_v21 = vld [vmem:[%s826_s30 + $0x5] ss:$0 sm:$0xff]  ;;  %v441_v23 = vperm.slane %v440_v9, 0 }
  0x30   : > { %v394_v16 = vadd.f32 %v393_v63, %v376_v56  ;;  %v399_v22 = vadd.f32 %v398_v7, %v381_v1  ;;  %v457_v24 = vadd.f32 %v454_v3, %v453_v62  ;;  %v460_v25 = vadd.f32 %v456_v5, %v455_v4  ;;  %v487_v26 = vld [vmem:[%s820_s27 + $0x7] sm:$0x1]  ;;  %v489_v31 = vld [vmem:[%s803_s23 + $0xc] sm:$0xf]  ;;  %v691_v39 = vld [vmem:[%s820_s27 + $0x1] ss:$0 sm:$0xff] }
  0x31   : > { %v488_v27 = vld [vmem:[%s826_s30 + $0x7] sm:$0x1]  ;;  %v474_v29 = vadd.f32 %v471_v15, %v470_v12  ;;  %v477_v30 = vadd.f32 %v473_v20, %v472_v19  ;;  %v490_v32 = vld [vmem:[%s806_s24 + $0xc] sm:$0xf]  ;;  %v442_v35 = vmul.f32 %v441_v23, %v830_v13  ;;  %v692_v44 = vld [vmem:[%s820_s27 + $0x3] ss:$0 sm:$0xff]  ;;  %v450_v54 = vmul.f32 %v691_v39, %v448_v49 }
  0x32   : > { %v411_v28 = vadd.f32 %v410_v6, %v394_v16  ;;  %v491_v33 = vadd.f32 %v488_v27, %v487_v26  ;;  %v416_v34 = vadd.f32 %v415_v8, %v399_v22  ;;  %v458_v36 = vperm.slane %v457_v24, 0  ;;  %v690_v38 = vld [vmem:[%s826_s30 + $0x7] ss:$0 sm:$0xff]  ;;  %v693_v50 = vld [vmem:[%s820_s27 + $0x5] ss:$0 sm:$0xff] }
  0x33   : > { %v462_v37 = vmul.f32 %v688_v11, %v460_v25  ;;  %v475_v41 = vperm.slane %v474_v29, 0  ;;  %v479_v42 = vmul.f32 %v689_v21, %v477_v30  ;;  %v446_v46 = vsub.f32 %v442_v35, %v445_v18  ;;  %v694_v51 = vld [vmem:[%s820_s27 + $0x7] ss:$0 sm:$0xff] }
  0x34   : > { %v428_v40 = vadd.f32 %v427_v10, %v411_v28  ;;  %v492_v43 = vperm.slane %v491_v33, 0  ;;  %v433_v45 = vadd.f32 %v432_v17, %v416_v34  ;;  %v459_v47 = vmul.f32 %v458_v36, %v455_v4 }
  0x35   : > { %v494_v48 = vadd.f32 %v490_v32, %v489_v31  ;;  %v476_v52 = vmul.f32 %v475_v41, %v472_v19  ;;  %v465_v55 = vsub.f32 %v456_v5, %v455_v4  ;;  %v482_v58 = vsub.f32 %v473_v20, %v472_v19 }
  0x36   : > { %434 = vst [vmem:[%s876_s7] sm:$0xf] %v428_v40  ;;  %v493_v53 = vmul.f32 %v492_v43, %v489_v31  ;;  %v463_v56 = vsub.f32 %v459_v47, %v462_v37  ;;  %v499_v59 = vsub.f32 %v490_v32, %v489_v31  ;;  %v451_v61 = vadd.f32 %v450_v54, %v442_v35 }
  0x37   : > { %435 = vst [vmem:[%s885_s10] sm:$0xf] %v433_v45  ;;  %v496_v57 = vmul.f32 %v690_v38, %v494_v48  ;;  %v480_v60 = vsub.f32 %v476_v52, %v479_v42  ;;  %v467_v62 = vmul.f32 %v692_v44, %v465_v55  ;;  %v484_v1 = vmul.f32 %v693_v50, %v482_v58 }
  0x38   : > { %v464_v63 = vadd.f32 %v463_v56, %v446_v46  ;;  %v501_v2 = vmul.f32 %v694_v51, %v499_v59 }
  0x39   : > { %v497_v0 = vsub.f32 %v493_v53, %v496_v57  ;;  %v468_v3 = vadd.f32 %v467_v62, %v459_v47  ;;  %v485_v7 = vadd.f32 %v484_v1, %v476_v52 }
  0x3a   : > { %v481_v6 = vadd.f32 %v480_v60, %v464_v63  ;;  %v502_v14 = vadd.f32 %v501_v2, %v493_v53 }
  0x3b   : > { %v469_v13 = vadd.f32 %v468_v3, %v451_v61 }
  0x3c   : > { %v498_v49 = vadd.f32 %v497_v0, %v481_v6 }
  0x3d   : > { %v486_v4 = vadd.f32 %v485_v7, %v469_v13 }
  0x3e   : > { %504 = vst [vmem:[%s876_s7 + $0x4] sm:$0xf] %v498_v49 }
  0x3f   : > { %v503_v5 = vadd.f32 %v502_v14, %v486_v4 }
  0x41   : > { %505 = vst [vmem:[%s885_s10 + $0x4] sm:$0xf] %v503_v5 }
  0x42 PF: > { %p13_p9 = scmp.ge.s32.totalorder %s766_s22, 4   ;;  %s914_s18 = smov %s713_s19 }
  0x43   : > { %s915_s19 = smov %s775_s25  ;;  %s916_s20 = smov %s766_s22 }
  0x44   :  { %15 = sbr.rel (!%p13_p9) target bundleno = 2 (0x2), region = 173 }

// kernel: reverse.1
= control target key start
LH: loop header
LB: loop body
LE: loop exit
PB: predicated region body
PF: predicated region fallthrough
CT: control target
= control target key end

     0   :  { %s1352_s0 = inlined_call_operand.vmem [shape: f32[2,4,16,16,7], index: 0, kind: input, shape index: {}]   ;;  %s1353_s1 = inlined_call_operand.vmem [shape: f32[2,4,16,16,7], index: 1, kind: output, shape index: {}]  }
   0x1   :  { %v448_v0 = vld [vmem:[%s1352_s0 + $0x60] sm:$0xff]  ;;  %v451_v2 = vld [vmem:[%s1352_s0 + $0xd0] sm:$0xff]  ;;  %v558_v56 = vld [vmem:[%s1352_s0 + $0x68] sm:$0xff] }
   0x2   :  { %v449_v1 = vld [vmem:[%s1352_s0 + $0x220] sm:$0xff]  ;;  %4 = vst [vmem:[%s1353_s1] sm:$0xff] %v448_v0  ;;  %v453_v3 = vld [vmem:[%s1352_s0 + $0x290] sm:$0xff]  ;;  %v560_v57 = vld [vmem:[%s1352_s0 + $0x228] sm:$0xff] }
   0x3   :  { %450 = vst [vmem:[%s1353_s1 + $0x1c0] sm:$0xff] %v449_v1  ;;  %v455_v4 = vld [vmem:[%s1352_s0 + $0x140] sm:$0xff]  ;;  %v459_v6 = vld [vmem:[%s1352_s0 + $0x1b0] sm:$0xff]  ;;  %v562_v58 = vld [vmem:[%s1352_s0 + $0xd8] sm:$0xff] }
   0x4   :  { %452 = vst [vmem:[%s1353_s1 + $0x70] sm:$0xff] %v451_v2  ;;  %v457_v5 = vld [vmem:[%s1352_s0 + $0x300] sm:$0xff]  ;;  %v461_v7 = vld [vmem:[%s1352_s0 + $0x370] sm:$0xff]  ;;  %v564_v59 = vld [vmem:[%s1352_s0 + $0x298] sm:$0xff] }
   0x5   :  { %454 = vst [vmem:[%s1353_s1 + $0x230] sm:$0xff] %v453_v3  ;;  %v463_v8 = vld [vmem:[%s1352_s0 + $0x50] sm:$0xff]  ;;  %v467_v10 = vld [vmem:[%s1352_s0 + $0xc0] sm:$0xff]  ;;  %v566_v60 = vld [vmem:[%s1352_s0 + $0x148] sm:$0xff] }
   0x6   :  { %456 = vst [vmem:[%s1353_s1 + $0xe0] sm:$0xff] %v455_v4  ;;  %v465_v9 = vld [vmem:[%s1352_s0 + $0x210] sm:$0xff]  ;;  %v469_v11 = vld [vmem:[%s1352_s0 + $0x280] sm:$0xff]  ;;  %v568_v61 = vld [vmem:[%s1352_s0 + $0x308] sm:$0xff] }
   0x7   :  { %458 = vst [vmem:[%s1353_s1 + $0x2a0] sm:$0xff] %v457_v5  ;;  %v471_v12 = vld [vmem:[%s1352_s0 + $0x130] sm:$0xff]  ;;  %v475_v14 = vld [vmem:[%s1352_s0 + $0x1a0] sm:$0xff]  ;;  %v570_v62 = vld [vmem:[%s1352_s0 + $0x1b8] sm:$0xff] }
   0x8   :  { %460 = vst [vmem:[%s1353_s1 + $0x150] sm:$0xff] %v459_v6  ;;  %v473_v13 = vld [vmem:[%s1352_s0 + $0x2f0] sm:$0xff]  ;;  %v477_v15 = vld [vmem:[%s1352_s0 + $0x360] sm:$0xff]  ;;  %v572_v63 = vld [vmem:[%s1352_s0 + $0x378] sm:$0xff] }
   0x9   :  { %462 = vst [vmem:[%s1353_s1 + $0x310] sm:$0xff] %v461_v7  ;;  %v479_v16 = vld [vmem:[%s1352_s0 + $0x40] sm:$0xff]  ;;  %v483_v18 = vld [vmem:[%s1352_s0 + $0xb0] sm:$0xff]  ;;  %v574_v0 = vld [vmem:[%s1352_s0 + $0x58] sm:$0xff] }
   0xa   :  { %464 = vst [vmem:[%s1353_s1 + $0x10] sm:$0xff] %v463_v8  ;;  %v481_v17 = vld [vmem:[%s1352_s0 + $0x200] sm:$0xff]  ;;  %v485_v19 = vld [vmem:[%s1352_s0 + $0x270] sm:$0xff]  ;;  %v576_v1 = vld [vmem:[%s1352_s0 + $0x218] sm:$0xff] }
   0xb   :  { %466 = vst [vmem:[%s1353_s1 + $0x1d0] sm:$0xff] %v465_v9  ;;  %v487_v20 = vld [vmem:[%s1352_s0 + $0x120] sm:$0xff]  ;;  %v491_v22 = vld [vmem:[%s1352_s0 + $0x190] sm:$0xff]  ;;  %v578_v2 = vld [vmem:[%s1352_s0 + $0xc8] sm:$0xff] }
   0xc   :  { %468 = vst [vmem:[%s1353_s1 + $0x80] sm:$0xff] %v467_v10  ;;  %v489_v21 = vld [vmem:[%s1352_s0 + $0x2e0] sm:$0xff]  ;;  %v493_v23 = vld [vmem:[%s1352_s0 + $0x350] sm:$0xff]  ;;  %v580_v3 = vld [vmem:[%s1352_s0 + $0x288] sm:$0xff] }
   0xd   :  { %470 = vst [vmem:[%s1353_s1 + $0x240] sm:$0xff] %v469_v11  ;;  %v495_v24 = vld [vmem:[%s1352_s0 + $0x30] sm:$0xff]  ;;  %v499_v26 = vld [vmem:[%s1352_s0 + $0xa0] sm:$0xff]  ;;  %v582_v4 = vld [vmem:[%s1352_s0 + $0x138] sm:$0xff] }
   0xe   :  { %472 = vst [vmem:[%s1353_s1 + $0xf0] sm:$0xff] %v471_v12  ;;  %v497_v25 = vld [vmem:[%s1352_s0 + $0x1f0] sm:$0xff]  ;;  %v501_v27 = vld [vmem:[%s1352_s0 + $0x260] sm:$0xff]  ;;  %v584_v5 = vld [vmem:[%s1352_s0 + $0x2f8] sm:$0xff] }
   0xf   :  { %474 = vst [vmem:[%s1353_s1 + $0x2b0] sm:$0xff] %v473_v13  ;;  %v503_v28 = vld [vmem:[%s1352_s0 + $0x110] sm:$0xff]  ;;  %v507_v30 = vld [vmem:[%s1352_s0 + $0x180] sm:$0xff]  ;;  %v586_v6 = vld [vmem:[%s1352_s0 + $0x1a8] sm:$0xff] }
  0x10   :  { %476 = vst [vmem:[%s1353_s1 + $0x160] sm:$0xff] %v475_v14  ;;  %v505_v29 = vld [vmem:[%s1352_s0 + $0x2d0] sm:$0xff]  ;;  %v509_v31 = vld [vmem:[%s1352_s0 + $0x340] sm:$0xff]  ;;  %v588_v7 = vld [vmem:[%s1352_s0 + $0x368] sm:$0xff] }
  0x11   :  { %478 = vst [vmem:[%s1353_s1 + $0x320] sm:$0xff] %v477_v15  ;;  %v511_v32 = vld [vmem:[%s1352_s0 + $0x20] sm:$0xff]  ;;  %v515_v34 = vld [vmem:[%s1352_s0 + $0x90] sm:$0xff]  ;;  %v590_v8 = vld [vmem:[%s1352_s0 + $0x48] sm:$0xff] }
  0x12   :  { %480 = vst [vmem:[%s1353_s1 + $0x20] sm:$0xff] %v479_v16  ;;  %v513_v33 = vld [vmem:[%s1352_s0 + $0x1e0] sm:$0xff]  ;;  %v517_v35 = vld [vmem:[%s1352_s0 + $0x250] sm:$0xff]  ;;  %v592_v9 = vld [vmem:[%s1352_s0 + $0x208] sm:$0xff] }
  0x13   :  { %482 = vst [vmem:[%s1353_s1 + $0x1e0] sm:$0xff] %v481_v17  ;;  %v519_v36 = vld [vmem:[%s1352_s0 + $0x100] sm:$0xff]  ;;  %v523_v38 = vld [vmem:[%s1352_s0 + $0x170] sm:$0xff]  ;;  %v594_v10 = vld [vmem:[%s1352_s0 + $0xb8] sm:$0xff] }
  0x14   :  { %484 = vst [vmem:[%s1353_s1 + $0x90] sm:$0xff] %v483_v18  ;;  %v521_v37 = vld [vmem:[%s1352_s0 + $0x2c0] sm:$0xff]  ;;  %v525_v39 = vld [vmem:[%s1352_s0 + $0x330] sm:$0xff]  ;;  %v596_v11 = vld [vmem:[%s1352_s0 + $0x278] sm:$0xff] }
  0x15   :  { %486 = vst [vmem:[%s1353_s1 + $0x250] sm:$0xff] %v485_v19  ;;  %v527_v40 = vld [vmem:[%s1352_s0 + $0x10] sm:$0xff]  ;;  %v531_v42 = vld [vmem:[%s1352_s0 + $0x80] sm:$0xff]  ;;  %v598_v12 = vld [vmem:[%s1352_s0 + $0x128] sm:$0xff] }
  0x16   :  { %488 = vst [vmem:[%s1353_s1 + $0x100] sm:$0xff] %v487_v20  ;;  %v529_v41 = vld [vmem:[%s1352_s0 + $0x1d0] sm:$0xff]  ;;  %v533_v43 = vld [vmem:[%s1352_s0 + $0x240] sm:$0xff]  ;;  %v600_v13 = vld [vmem:[%s1352_s0 + $0x2e8] sm:$0xff] }
  0x17   :  { %490 = vst [vmem:[%s1353_s1 + $0x2c0] sm:$0xff] %v489_v21  ;;  %v535_v44 = vld [vmem:[%s1352_s0 + $0xf0] sm:$0xff]  ;;  %v539_v46 = vld [vmem:[%s1352_s0 + $0x160] sm:$0xff]  ;;  %v602_v14 = vld [vmem:[%s1352_s0 + $0x198] sm:$0xff] }
  0x18   :  { %492 = vst [vmem:[%s1353_s1 + $0x170] sm:$0xff] %v491_v22  ;;  %v537_v45 = vld [vmem:[%s1352_s0 + $0x2b0] sm:$0xff]  ;;  %v541_v47 = vld [vmem:[%s1352_s0 + $0x320] sm:$0xff]  ;;  %v604_v15 = vld [vmem:[%s1352_s0 + $0x358] sm:$0xff] }
  0x19   :  { %494 = vst [vmem:[%s1353_s1 + $0x330] sm:$0xff] %v493_v23  ;;  %v193_v48 = vld [vmem:[%s1352_s0] sm:$0xff]  ;;  %v546_v50 = vld [vmem:[%s1352_s0 + $0x70] sm:$0xff]  ;;  %v606_v16 = vld [vmem:[%s1352_s0 + $0x38] sm:$0xff] }
  0x1a   :  { %496 = vst [vmem:[%s1353_s1 + $0x30] sm:$0xff] %v495_v24  ;;  %v544_v49 = vld [vmem:[%s1352_s0 + $0x1c0] sm:$0xff]  ;;  %v548_v51 = vld [vmem:[%s1352_s0 + $0x230] sm:$0xff]  ;;  %v608_v17 = vld [vmem:[%s1352_s0 + $0x1f8] sm:$0xff] }
  0x1b   :  { %498 = vst [vmem:[%s1353_s1 + $0x1f0] sm:$0xff] %v497_v25  ;;  %v550_v52 = vld [vmem:[%s1352_s0 + $0xe0] sm:$0xff]  ;;  %v554_v54 = vld [vmem:[%s1352_s0 + $0x150] sm:$0xff]  ;;  %v610_v18 = vld [vmem:[%s1352_s0 + $0xa8] sm:$0xff] }
  0x1c   :  { %500 = vst [vmem:[%s1353_s1 + $0xa0] sm:$0xff] %v499_v26  ;;  %v552_v53 = vld [vmem:[%s1352_s0 + $0x2a0] sm:$0xff]  ;;  %v556_v55 = vld [vmem:[%s1352_s0 + $0x310] sm:$0xff]  ;;  %v612_v19 = vld [vmem:[%s1352_s0 + $0x268] sm:$0xff] }
  0x1d   :  { %502 = vst [vmem:[%s1353_s1 + $0x260] sm:$0xff] %v501_v27  ;;  %v614_v20 = vld [vmem:[%s1352_s0 + $0x118] sm:$0xff]  ;;  %v618_v22 = vld [vmem:[%s1352_s0 + $0x188] sm:$0xff] }
  0x1e   :  { %504 = vst [vmem:[%s1353_s1 + $0x110] sm:$0xff] %v503_v28  ;;  %v616_v21 = vld [vmem:[%s1352_s0 + $0x2d8] sm:$0xff]  ;;  %v620_v23 = vld [vmem:[%s1352_s0 + $0x348] sm:$0xff] }
  0x1f   :  { %506 = vst [vmem:[%s1353_s1 + $0x2d0] sm:$0xff] %v505_v29  ;;  %v622_v24 = vld [vmem:[%s1352_s0 + $0x28] sm:$0xff]  ;;  %v626_v26 = vld [vmem:[%s1352_s0 + $0x98] sm:$0xff] }
  0x20   :  { %508 = vst [vmem:[%s1353_s1 + $0x180] sm:$0xff] %v507_v30  ;;  %v624_v25 = vld [vmem:[%s1352_s0 + $0x1e8] sm:$0xff]  ;;  %v628_v27 = vld [vmem:[%s1352_s0 + $0x258] sm:$0xff] }
  0x21   :  { %510 = vst [vmem:[%s1353_s1 + $0x340] sm:$0xff] %v509_v31  ;;  %v630_v28 = vld [vmem:[%s1352_s0 + $0x108] sm:$0xff]  ;;  %v634_v30 = vld [vmem:[%s1352_s0 + $0x178] sm:$0xff] }
  0x22   :  { %512 = vst [vmem:[%s1353_s1 + $0x40] sm:$0xff] %v511_v32  ;;  %v632_v29 = vld [vmem:[%s1352_s0 + $0x2c8] sm:$0xff]  ;;  %v636_v31 = vld [vmem:[%s1352_s0 + $0x338] sm:$0xff] }
  0x23   :  { %514 = vst [vmem:[%s1353_s1 + $0x200] sm:$0xff] %v513_v33  ;;  %v638_v32 = vld [vmem:[%s1352_s0 + $0x18] sm:$0xff] }
  0x24   :  { %516 = vst [vmem:[%s1353_s1 + $0xb0] sm:$0xff] %v515_v34  ;;  %v640_v33 = vld [vmem:[%s1352_s0 + $0x1d8] sm:$0xff]  ;;  %v642_v34 = vld [vmem:[%s1352_s0 + $0x88] sm:$0xff] }
  0x25   :  { %518 = vst [vmem:[%s1353_s1 + $0x270] sm:$0xff] %v517_v35  ;;  %v644_v35 = vld [vmem:[%s1352_s0 + $0x248] sm:$0xff] }
  0x26   :  { %520 = vst [vmem:[%s1353_s1 + $0x120] sm:$0xff] %v519_v36  ;;  %v646_v36 = vld [vmem:[%s1352_s0 + $0xf8] sm:$0xff] }
  0x27   :  { %522 = vst [vmem:[%s1353_s1 + $0x2e0] sm:$0xff] %v521_v37  ;;  %v648_v37 = vld [vmem:[%s1352_s0 + $0x2b8] sm:$0xff] }
  0x28   :  { %524 = vst [vmem:[%s1353_s1 + $0x190] sm:$0xff] %v523_v38  ;;  %v650_v38 = vld [vmem:[%s1352_s0 + $0x168] sm:$0xff] }
  0x29   :  { %526 = vst [vmem:[%s1353_s1 + $0x350] sm:$0xff] %v525_v39  ;;  %v652_v39 = vld [vmem:[%s1352_s0 + $0x328] sm:$0xff] }
  0x2a   :  { %528 = vst [vmem:[%s1353_s1 + $0x50] sm:$0xff] %v527_v40  ;;  %v654_v40 = vld [vmem:[%s1352_s0 + $0x8] sm:$0xff] }
  0x2b   :  { %530 = vst [vmem:[%s1353_s1 + $0x210] sm:$0xff] %v529_v41  ;;  %v656_v41 = vld [vmem:[%s1352_s0 + $0x1c8] sm:$0xff] }
  0x2c   :  { %532 = vst [vmem:[%s1353_s1 + $0xc0] sm:$0xff] %v531_v42  ;;  %v658_v42 = vld [vmem:[%s1352_s0 + $0x78] sm:$0xff] }
  0x2d   :  { %534 = vst [vmem:[%s1353_s1 + $0x280] sm:$0xff] %v533_v43  ;;  %v660_v43 = vld [vmem:[%s1352_s0 + $0x238] sm:$0xff] }
  0x2e   :  { %536 = vst [vmem:[%s1353_s1 + $0x130] sm:$0xff] %v535_v44  ;;  %v662_v44 = vld [vmem:[%s1352_s0 + $0xe8] sm:$0xff] }
  0x2f   :  { %538 = vst [vmem:[%s1353_s1 + $0x2f0] sm:$0xff] %v537_v45  ;;  %v664_v45 = vld [vmem:[%s1352_s0 + $0x2a8] sm:$0xff] }
  0x30   :  { %540 = vst [vmem:[%s1353_s1 + $0x1a0] sm:$0xff] %v539_v46  ;;  %v666_v46 = vld [vmem:[%s1352_s0 + $0x158] sm:$0xff] }
  0x31   :  { %542 = vst [vmem:[%s1353_s1 + $0x360] sm:$0xff] %v541_v47  ;;  %v668_v47 = vld [vmem:[%s1352_s0 + $0x318] sm:$0xff] }
  0x32   :  { %543 = vst [vmem:[%s1353_s1 + $0x60] sm:$0xff] %v193_v48 }
  0x33   :  { %545 = vst [vmem:[%s1353_s1 + $0x220] sm:$0xff] %v544_v49 }
  0x34   :  { %547 = vst [vmem:[%s1353_s1 + $0xd0] sm:$0xff] %v546_v50 }
  0x35   :  { %549 = vst [vmem:[%s1353_s1 + $0x290] sm:$0xff] %v548_v51 }
  0x36   :  { %551 = vst [vmem:[%s1353_s1 + $0x140] sm:$0xff] %v550_v52 }
  0x37   :  { %553 = vst [vmem:[%s1353_s1 + $0x300] sm:$0xff] %v552_v53 }
  0x38   :  { %555 = vst [vmem:[%s1353_s1 + $0x1b0] sm:$0xff] %v554_v54 }
  0x39   :  { %557 = vst [vmem:[%s1353_s1 + $0x370] sm:$0xff] %v556_v55 }
  0x3a   :  { %559 = vst [vmem:[%s1353_s1 + $0x8] sm:$0xff] %v558_v56 }
  0x3b   :  { %561 = vst [vmem:[%s1353_s1 + $0x1c8] sm:$0xff] %v560_v57 }
  0x3c   :  { %563 = vst [vmem:[%s1353_s1 + $0x78] sm:$0xff] %v562_v58 }
  0x3d   :  { %565 = vst [vmem:[%s1353_s1 + $0x238] sm:$0xff] %v564_v59 }
  0x3e   :  { %567 = vst [vmem:[%s1353_s1 + $0xe8] sm:$0xff] %v566_v60 }
  0x3f   :  { %569 = vst [vmem:[%s1353_s1 + $0x2a8] sm:$0xff] %v568_v61 }
  0x40   :  { %571 = vst [vmem:[%s1353_s1 + $0x158] sm:$0xff] %v570_v62 }
  0x41   :  { %573 = vst [vmem:[%s1353_s1 + $0x318] sm:$0xff] %v572_v63 }
  0x42   :  { %575 = vst [vmem:[%s1353_s1 + $0x18] sm:$0xff] %v574_v0 }
  0x43   :  { %577 = vst [vmem:[%s1353_s1 + $0x1d8] sm:$0xff] %v576_v1 }
  0x44   :  { %579 = vst [vmem:[%s1353_s1 + $0x88] sm:$0xff] %v578_v2 }
  0x45   :  { %581 = vst [vmem:[%s1353_s1 + $0x248] sm:$0xff] %v580_v3 }
  0x46   :  { %583 = vst [vmem:[%s1353_s1 + $0xf8] sm:$0xff] %v582_v4 }
  0x47   :  { %585 = vst [vmem:[%s1353_s1 + $0x2b8] sm:$0xff] %v584_v5 }
  0x48   :  { %587 = vst [vmem:[%s1353_s1 + $0x168] sm:$0xff] %v586_v6 }
  0x49   :  { %589 = vst [vmem:[%s1353_s1 + $0x328] sm:$0xff] %v588_v7 }
  0x4a   :  { %591 = vst [vmem:[%s1353_s1 + $0x28] sm:$0xff] %v590_v8 }
  0x4b   :  { %593 = vst [vmem:[%s1353_s1 + $0x1e8] sm:$0xff] %v592_v9 }
  0x4c   :  { %595 = vst [vmem:[%s1353_s1 + $0x98] sm:$0xff] %v594_v10 }
  0x4d   :  { %597 = vst [vmem:[%s1353_s1 + $0x258] sm:$0xff] %v596_v11 }
  0x4e   :  { %599 = vst [vmem:[%s1353_s1 + $0x108] sm:$0xff] %v598_v12 }
  0x4f   :  { %601 = vst [vmem:[%s1353_s1 + $0x2c8] sm:$0xff] %v600_v13 }
  0x50   :  { %603 = vst [vmem:[%s1353_s1 + $0x178] sm:$0xff] %v602_v14 }
  0x51   :  { %605 = vst [vmem:[%s1353_s1 + $0x338] sm:$0xff] %v604_v15 }
  0x52   :  { %607 = vst [vmem:[%s1353_s1 + $0x38] sm:$0xff] %v606_v16 }
  0x53   :  { %609 = vst [vmem:[%s1353_s1 + $0x1f8] sm:$0xff] %v608_v17 }
  0x54   :  { %611 = vst [vmem:[%s1353_s1 + $0xa8] sm:$0xff] %v610_v18 }
  0x55   :  { %613 = vst [vmem:[%s1353_s1 + $0x268] sm:$0xff] %v612_v19 }
  0x56   :  { %615 = vst [vmem:[%s1353_s1 + $0x118] sm:$0xff] %v614_v20 }
  0x57   :  { %617 = vst [vmem:[%s1353_s1 + $0x2d8] sm:$0xff] %v616_v21 }
  0x58   :  { %619 = vst [vmem:[%s1353_s1 + $0x188] sm:$0xff] %v618_v22 }
  0x59   :  { %621 = vst [vmem:[%s1353_s1 + $0x348] sm:$0xff] %v620_v23 }
  0x5a   :  { %623 = vst [vmem:[%s1353_s1 + $0x48] sm:$0xff] %v622_v24 }
  0x5b   :  { %625 = vst [vmem:[%s1353_s1 + $0x208] sm:$0xff] %v624_v25 }
  0x5c   :  { %627 = vst [vmem:[%s1353_s1 + $0xb8] sm:$0xff] %v626_v26 }
  0x5d   :  { %629 = vst [vmem:[%s1353_s1 + $0x278] sm:$0xff] %v628_v27 }
  0x5e   :  { %631 = vst [vmem:[%s1353_s1 + $0x128] sm:$0xff] %v630_v28 }
  0x5f   :  { %633 = vst [vmem:[%s1353_s1 + $0x2e8] sm:$0xff] %v632_v29 }
  0x60   :  { %635 = vst [vmem:[%s1353_s1 + $0x198] sm:$0xff] %v634_v30 }
  0x61   :  { %637 = vst [vmem:[%s1353_s1 + $0x358] sm:$0xff] %v636_v31 }
  0x62   :  { %639 = vst [vmem:[%s1353_s1 + $0x58] sm:$0xff] %v638_v32 }
  0x63   :  { %641 = vst [vmem:[%s1353_s1 + $0x218] sm:$0xff] %v640_v33 }
  0x64   :  { %643 = vst [vmem:[%s1353_s1 + $0xc8] sm:$0xff] %v642_v34 }
  0x65   :  { %645 = vst [vmem:[%s1353_s1 + $0x288] sm:$0xff] %v644_v35 }
  0x66   :  { %647 = vst [vmem:[%s1353_s1 + $0x138] sm:$0xff] %v646_v36 }
  0x67   :  { %649 = vst [vmem:[%s1353_s1 + $0x2f8] sm:$0xff] %v648_v37 }
  0x68   :  { %651 = vst [vmem:[%s1353_s1 + $0x1a8] sm:$0xff] %v650_v38 }
  0x69   :  { %653 = vst [vmem:[%s1353_s1 + $0x368] sm:$0xff] %v652_v39 }
  0x6a   :  { %655 = vst [vmem:[%s1353_s1 + $0x68] sm:$0xff] %v654_v40 }
  0x6b   :  { %657 = vst [vmem:[%s1353_s1 + $0x228] sm:$0xff] %v656_v41 }
  0x6c   :  { %659 = vst [vmem:[%s1353_s1 + $0xd8] sm:$0xff] %v658_v42 }
  0x6d   :  { %661 = vst [vmem:[%s1353_s1 + $0x298] sm:$0xff] %v660_v43 }
  0x6e   :  { %663 = vst [vmem:[%s1353_s1 + $0x148] sm:$0xff] %v662_v44 }
  0x6f   :  { %665 = vst [vmem:[%s1353_s1 + $0x308] sm:$0xff] %v664_v45 }
  0x70   :  { %667 = vst [vmem:[%s1353_s1 + $0x1b8] sm:$0xff] %v666_v46 }
  0x71   :  { %669 = vst [vmem:[%s1353_s1 + $0x378] sm:$0xff] %v668_v47 }

</bundles_post_ra>
